<compile_context>
chip_gen: v7x
topology: tpu7x:2x2x1
jax: 0.10.0
libtpu: 0.0.40
codegen_flags: <defaults>
</compile_context>

<pallas_src>
from typing import NamedTuple, Optional

import jax
import jax.numpy as jnp
from jax.experimental import pallas as pl
from jax.experimental.pallas import tpu as pltpu


def _round_up(n, m):
    return ((n + m - 1) // m) * m


def _gatenn_kernel(x_ref, w1_ref, b1_ref, w2_ref, b2_ref, o_ref):
    """out = 2 * sigmoid(relu(x @ W1 + b1) @ W2 + b2); MXU matmuls, f32 accum + f32 tail."""
    w1 = w1_ref[...]
    x = x_ref[...]
    if x.dtype != w1.dtype:            # normally a no-op: the wrapper pre-casts x
        x = x.astype(w1.dtype)
    # First linear (MXU) + bias + ReLU, f32 accumulation.
    h = jnp.dot(x, w1, preferred_element_type=jnp.float32)
    h = jnp.maximum(h + b1_ref[...], 0.0)
    # Second linear (MXU) + bias, f32 accumulation.
    h = h.astype(w2_ref.dtype)         # bf16 operands when the weights are bf16
    y = jnp.dot(h, w2_ref[...], preferred_element_type=jnp.float32)
    y = y + b2_ref[...]
    # sigmoid*2 tail: exp goes to the EUP slot; exact reciprocal keeps f32 numerics tight.
    o_ref[...] = (2.0 * pl.reciprocal(1.0 + jnp.exp(-y), approx=False)).astype(o_ref.dtype)


class GateNNParams(NamedTuple):
    w1: jax.Array   # (Dinp, Hp)  padded, (in_features, out_features) layout
    b1: jax.Array   # (1, Hp)     f32
    w2: jax.Array   # (Hp, Dp)    padded
    b2: jax.Array   # (1, Dp)     f32


def prepare_gate_nn_params(w1, b1, w2, b2, *, mxu_dtype=None):
    """One-time parameter preprocessing (hoisted out of the per-call forward path).

    Weights use the (in_features, out_features) layout. Every feature dim is zero-padded
    to a multiple of 128 lanes; optionally the weights are cast to the MXU operand dtype
    (bf16 is a win on v5e/v6e/v7x alike). Accumulation and the bias/ReLU/sigmoid tail
    stay f32 inside the kernel, so the biases remain f32 here.
    """
    din, h = w1.shape
    h2, dout = w2.shape
    assert h == h2 and b1.shape == (h,) and b2.shape == (dout,)
    dinp, hp, dp = _round_up(din, 128), _round_up(h, 128), _round_up(dout, 128)
    w1p = jnp.pad(w1, ((0, dinp - din), (0, hp - h)))
    w2p = jnp.pad(w2, ((0, hp - h), (0, dp - dout)))
    if mxu_dtype is not None:
        w1p = w1p.astype(mxu_dtype)
        w2p = w2p.astype(mxu_dtype)
    b1p = jnp.pad(b1, (0, hp - h)).reshape(1, hp).astype(jnp.float32)
    b2p = jnp.pad(b2, (0, dp - dout)).reshape(1, dp).astype(jnp.float32)
    return GateNNParams(w1p, b1p, w2p, b2p)


def _choose_batch_tiling(B, tile_b=None, max_tile=512):
    """Bounded batch tile (multiple of 8, <= max_tile). Guarantees >= 2 grid steps when
    B > 8 so the 'parallel' batch axis can shard across v7x's two TensorCores."""
    if tile_b is None:
        b8 = _round_up(B, 8)
        num_steps = 1 if b8 <= 8 else max(2, -(-b8 // max_tile))
        tile_b = _round_up(-(-b8 // num_steps), 8)
    else:
        tile_b = _round_up(min(tile_b, max_tile), 8)
    num_steps = -(-B // tile_b)
    return tile_b, num_steps, tile_b * num_steps


def _vmem_limit_bytes(tile_b, dinp, hp, dp, x_itemsize, w_itemsize, out_itemsize, x_buffers):
    weights = (dinp * hp + hp * dp) * w_itemsize          # resident, single-buffered
    biases = (hp + dp) * 4
    x_tiles = x_buffers * tile_b * dinp * x_itemsize      # streamed, multi-buffered
    out_tiles = 2 * tile_b * dp * out_itemsize            # double-buffered writeback
    need = weights + biases + x_tiles + out_tiles
    try:   # generation-aware cap (v7x: 64 MiB physical; v5e/v6e: 128 MiB)
        cap = int(pltpu.get_tpu_info().vmem_capacity_bytes) * 7 // 8
    except Exception:
        cap = 56 << 20                                     # safe on every generation
    want = int(need * 1.5) + (2 << 20)                     # slack for vregs / internal scratch
    return max(min(want, cap), min(32 << 20, cap))


_WEIGHT_SINGLE_BUFFER: Optional[bool] = None   # lazily-probed pl.Buffered(1) support


def gate_nn_forward(x, params: GateNNParams, *, output_dim, out_dtype=None,
                    tile_b=None, return_padded=False):
    """Fused GateNN forward: out = 2 * sigmoid(relu(x @ W1 + b1) @ W2 + b2)."""
    global _WEIGHT_SINGLE_BUFFER
    B, din = x.shape
    dinp, hp = params.w1.shape
    hp2, dp = params.w2.shape
    assert hp == hp2 and din <= dinp and output_dim <= dp
    out_dtype = x.dtype if out_dtype is None else out_dtype

    # bf16 weights => bf16 MXU operands: pre-cast x here so its streamed HBM bytes halve.
    if params.w1.dtype != jnp.float32 and x.dtype != params.w1.dtype:
        x = x.astype(params.w1.dtype)

    tile_b, num_steps, bp = _choose_batch_tiling(B, tile_b)

    # Lane/sublane-dense padding of the streamed activations (zeros are exact: padded K
    # columns contribute 0; padded batch rows / output lanes are sliced off below).
    if (bp, dinp) != (B, din):
        x = jnp.pad(x, ((0, bp - B), (0, dinp - din)))

    x_itemsize = jnp.dtype(x.dtype).itemsize
    out_itemsize = jnp.dtype(out_dtype).itemsize
    w_itemsize = jnp.dtype(params.w1.dtype).itemsize
    x_buffers = 3 if num_steps > 2 else 2

    cost = pl.CostEstimate(
        flops=2 * bp * (dinp * hp + hp * dp),
        transcendentals=bp * dp,
        bytes_accessed=(bp * dinp * x_itemsize
                        + (dinp * hp + hp * dp) * w_itemsize
                        + (hp + dp) * 4
                        + bp * dp * out_itemsize),
    )
    compiler_params = pltpu.CompilerParams(
        dimension_semantics=("parallel",),
        vmem_limit_bytes=_vmem_limit_bytes(tile_b, dinp, hp, dp, x_itemsize,
                                           w_itemsize, out_itemsize, x_buffers),
    )

    def make_call(use_pipeline_mode):
        if use_pipeline_mode:
            resident = dict(pipeline_mode=pl.Buffered(1))          # fetched once, 1 buffer
            x_kw = dict(pipeline_mode=pl.Buffered(x_buffers)) if num_steps > 2 else {}
        else:
            resident, x_kw = {}, {}
        return pl.pallas_call(
            _gatenn_kernel,
            out_shape=jax.ShapeDtypeStruct((bp, dp), out_dtype),
            grid_spec=pltpu.PrefetchScalarGridSpec(
                num_scalar_prefetch=0,
                grid=(num_steps,),
                in_specs=[
                    pl.BlockSpec((tile_b, dinp), lambda i: (i, 0), **x_kw),  # x (streams)
                    pl.BlockSpec((dinp, hp), lambda i: (0, 0), **resident),  # W1 (resident)
                    pl.BlockSpec((1, hp), lambda i: (0, 0), **resident),     # b1
                    pl.BlockSpec((hp, dp), lambda i: (0, 0), **resident),    # W2 (resident)
                    pl.BlockSpec((1, dp), lambda i: (0, 0), **resident),     # b2
                ],
                out_specs=pl.BlockSpec((tile_b, dp), lambda i: (i, 0)),
            ),
            compiler_params=compiler_params,
            cost_estimate=cost,
        )

    args = (x, params.w1, params.b1, params.w2, params.b2)
    if _WEIGHT_SINGLE_BUFFER is None:
        # One-time probe: prefer single-buffered resident weights (halves their VMEM
        # footprint -- matters under v7x's 64 MiB); fall back if this build rejects it.
        try:
            out = jax.block_until_ready(make_call(True)(*args))
            _WEIGHT_SINGLE_BUFFER = True
        except Exception:
            out = make_call(False)(*args)
            _WEIGHT_SINGLE_BUFFER = False
    else:
        out = make_call(_WEIGHT_SINGLE_BUFFER)(*args)

    if return_padded:
        return out
    return out[:B, :output_dim] if (bp, dp) != (B, output_dim) else out


def gate_nn(x, w1, b1, w2, b2, *, mxu_dtype=None, dropout_rate=0.0, batch_norm=False,
            out_dtype=None, tile_b=None):
    """One-shot convenience wrapper (re-prepares params each call; in a real forward path
    hoist prepare_gate_nn_params() out and call gate_nn_forward() directly)."""
    if batch_norm or dropout_rate > 0.0:
        # TODO(synk): BatchNorm1d / Dropout branches of GateNN are not implemented.
        raise NotImplementedError("GateNN Pallas kernel: batch_norm/dropout not supported")
    params = prepare_gate_nn_params(w1, b1, w2, b2, mxu_dtype=mxu_dtype)
    return gate_nn_forward(x, params, output_dim=w2.shape[1],
                           out_dtype=out_dtype, tile_b=tile_b)


if __name__ == "__main__":
    # GateNN(input_dim=32, hidden_dim=32, output_dim=16), batch=16
    B, Din, H, Dout = 16, 32, 32, 16

    key = jax.random.PRNGKey(0)
    kx, kw1, kb1, kw2, kb2 = jax.random.split(key, 5)

    x = jax.random.normal(kx, (B, Din), dtype=jnp.float32)
    # PyTorch Linear weight is (out, in); stored here pre-transposed as (in, out).
    w1 = jax.random.uniform(kw1, (Din, H), jnp.float32, -0.1, 0.1)
    b1 = jax.random.uniform(kb1, (H,), jnp.float32, -0.1, 0.1)
    w2 = jax.random.uniform(kw2, (H, Dout), jnp.float32, -0.1, 0.1)
    b2 = jax.random.uniform(kb2, (Dout,), jnp.float32, -0.1, 0.1)

    # Pure-JAX reference of the same forward semantics.
    ref = 2.0 * jax.nn.sigmoid(jnp.maximum(x @ w1 + b1, 0.0) @ w2 + b2)

    # f32 path; params prepared once and reused. Tolerance covers TPU default matmul
    # precision differences (bf16 operand passes) between XLA and the Pallas kernel.
    params_f32 = prepare_gate_nn_params(w1, b1, w2, b2)
    out = jax.block_until_ready(gate_nn_forward(x, params_f32, output_dim=Dout))
    assert out.shape == (B, Dout)
    assert jnp.allclose(out, ref, atol=3e-3, rtol=3e-3), "f32 path mismatch"

    # bf16 MXU-operand path (valid on v5e/v6e/v7x; f32 accumulation + f32 tail).
    params_bf16 = prepare_gate_nn_params(w1, b1, w2, b2, mxu_dtype=jnp.bfloat16)
    out_bf16 = jax.block_until_ready(gate_nn_forward(x, params_bf16, output_dim=Dout))
    assert out_bf16.shape == (B, Dout)
    assert jnp.allclose(out_bf16, ref, atol=2e-2, rtol=2e-2), "bf16 path mismatch"

    # Convenience one-shot wrapper path.
    out2 = jax.block_until_ready(gate_nn(x, w1, b1, w2, b2))
    assert out2.shape == (B, Dout)
    assert jnp.allclose(out2, ref, atol=3e-3, rtol=3e-3), "wrapper path mismatch"

    print("KERNEL_OK")
</pallas_src>

<mosaic_0001>
module attributes {stable_mosaic.version = 11 : i64} {
  func.func @_gatenn_kernel(%arg0: i32, %arg1: memref<8x128xf32, #tpu.memory_space<vmem>>, %arg2: memref<128x128xf32, #tpu.memory_space<vmem>>, %arg3: memref<1x128xf32, #tpu.memory_space<vmem>>, %arg4: memref<128x128xf32, #tpu.memory_space<vmem>>, %arg5: memref<1x128xf32, #tpu.memory_space<vmem>>, %arg6: memref<8x128xf32, #tpu.memory_space<vmem>>) attributes {dimension_semantics = [#tpu.dimension_semantics<parallel>], iteration_bounds = array<i64: 2>, scalar_prefetch = 0 : i64, scratch_operands = 0 : i64, tpu.core_type = #tpu.core_type<tc>, window_params = [{transform_indices = @transform_0, window_bounds = array<i64: 8, 128>}, {pipeline_mode = #tpu.pipeline_mode<synchronous>, transform_indices = @transform_1, window_bounds = array<i64: 128, 128>}, {pipeline_mode = #tpu.pipeline_mode<synchronous>, transform_indices = @transform_2, window_bounds = array<i64: 1, 128>}, {pipeline_mode = #tpu.pipeline_mode<synchronous>, transform_indices = @transform_3, window_bounds = array<i64: 128, 128>}, {pipeline_mode = #tpu.pipeline_mode<synchronous>, transform_indices = @transform_4, window_bounds = array<i64: 1, 128>}, {transform_indices = @transform_5, window_bounds = array<i64: 8, 128>}]} {
    %c0 = arith.constant 0 : index
    %c0_0 = arith.constant 0 : index
    %0 = vector.load %arg2[%c0, %c0_0] : memref<128x128xf32, #tpu.memory_space<vmem>>, vector<128x128xf32>
    %c0_1 = arith.constant 0 : index
    %c0_2 = arith.constant 0 : index
    %1 = vector.load %arg1[%c0_1, %c0_2] : memref<8x128xf32, #tpu.memory_space<vmem>>, vector<8x128xf32>
    %cst = arith.constant dense<0.000000e+00> : vector<8x128xf32>
    %2 = tpu.matmul %1, %0, %cst {dimension_numbers = #tpu.dot_dimension_numbers<[1], [0], [0], [1], [0, 0, 1, 1], [], []>} : vector<8x128xf32>, vector<128x128xf32>, vector<8x128xf32> -> vector<8x128xf32>
    %c0_3 = arith.constant 0 : index
    %c0_4 = arith.constant 0 : index
    %3 = vector.load %arg3[%c0_3, %c0_4] : memref<1x128xf32, #tpu.memory_space<vmem>>, vector<1x128xf32>
    %4 = vector.broadcast %3 : vector<1x128xf32> to vector<8x128xf32>
    %5 = arith.addf %2, %4 : vector<8x128xf32>
    %cst_5 = arith.constant 0.000000e+00 : f32
    %6 = vector.broadcast %cst_5 : f32 to vector<8x128xf32>
    %7 = arith.maximumf %5, %6 : vector<8x128xf32>
    %c0_6 = arith.constant 0 : index
    %c0_7 = arith.constant 0 : index
    %8 = vector.load %arg4[%c0_6, %c0_7] : memref<128x128xf32, #tpu.memory_space<vmem>>, vector<128x128xf32>
    %cst_8 = arith.constant dense<0.000000e+00> : vector<8x128xf32>
    %9 = tpu.matmul %7, %8, %cst_8 {dimension_numbers = #tpu.dot_dimension_numbers<[1], [0], [0], [1], [0, 0, 1, 1], [], []>} : vector<8x128xf32>, vector<128x128xf32>, vector<8x128xf32> -> vector<8x128xf32>
    %c0_9 = arith.constant 0 : index
    %c0_10 = arith.constant 0 : index
    %10 = vector.load %arg5[%c0_9, %c0_10] : memref<1x128xf32, #tpu.memory_space<vmem>>, vector<1x128xf32>
    %11 = vector.broadcast %10 : vector<1x128xf32> to vector<8x128xf32>
    %12 = arith.addf %9, %11 : vector<8x128xf32>
    %cst_11 = arith.constant 0.000000e+00 : f32
    %13 = vector.broadcast %cst_11 : f32 to vector<8x128xf32>
    %14 = arith.subf %13, %12 : vector<8x128xf32>
    %15 = math.exp %14 : vector<8x128xf32>
    %cst_12 = arith.constant 1.000000e+00 : f32
    %16 = vector.broadcast %cst_12 : f32 to vector<8x128xf32>
    %17 = arith.addf %16, %15 : vector<8x128xf32>
    %18 = tpu.reciprocal %17 : vector<8x128xf32> -> vector<8x128xf32>
    %cst_13 = arith.constant 2.000000e+00 : f32
    %19 = vector.broadcast %cst_13 : f32 to vector<8x128xf32>
    %20 = arith.mulf %19, %18 : vector<8x128xf32>
    %c0_14 = arith.constant 0 : index
    %c0_15 = arith.constant 0 : index
    %21 = vector.load %arg6[%c0_14, %c0_15] : memref<8x128xf32, #tpu.memory_space<vmem>>, vector<8x128xf32>
    tpu.vector_store %arg6[%c0_14, %c0_15], %20 {strides = array<i32>} : memref<8x128xf32, #tpu.memory_space<vmem>>, vector<8x128xf32>,
    return
  }
  func.func @transform_0(%arg0: i32) -> (i32, i32) {
    %c0_i32 = arith.constant 0 : i32
    %c0_i32_0 = arith.constant 0 : i32
    return %arg0, %c0_i32 : i32, i32
  }
  func.func @transform_1(%arg0: i32) -> (i32, i32) {
    %c0_i32 = arith.constant 0 : i32
    %c0_i32_0 = arith.constant 0 : i32
    %c0_i32_1 = arith.constant 0 : i32
    return %c0_i32, %c0_i32_0 : i32, i32
  }
  func.func @transform_2(%arg0: i32) -> (i32, i32) {
    %c0_i32 = arith.constant 0 : i32
    %c0_i32_0 = arith.constant 0 : i32
    %c0_i32_1 = arith.constant 0 : i32
    return %c0_i32, %c0_i32_0 : i32, i32
  }
  func.func @transform_3(%arg0: i32) -> (i32, i32) {
    %c0_i32 = arith.constant 0 : i32
    %c0_i32_0 = arith.constant 0 : i32
    %c0_i32_1 = arith.constant 0 : i32
    return %c0_i32, %c0_i32_0 : i32, i32
  }
  func.func @transform_4(%arg0: i32) -> (i32, i32) {
    %c0_i32 = arith.constant 0 : i32
    %c0_i32_0 = arith.constant 0 : i32
    %c0_i32_1 = arith.constant 0 : i32
    return %c0_i32, %c0_i32_0 : i32, i32
  }
  func.func @transform_5(%arg0: i32) -> (i32, i32) {
    %c0_i32 = arith.constant 0 : i32
    %c0_i32_0 = arith.constant 0 : i32
    return %arg0, %c0_i32 : i32, i32
  }
}

module attributes {stable_mosaic.version = 11 : i64} {
  func.func @_gatenn_kernel(%arg0: i32, %arg1: memref<8x128xf32, #tpu.memory_space<vmem>>, %arg2: memref<128x128xf32, #tpu.memory_space<vmem>>, %arg3: memref<1x128xf32, #tpu.memory_space<vmem>>, %arg4: memref<128x128xf32, #tpu.memory_space<vmem>>, %arg5: memref<1x128xf32, #tpu.memory_space<vmem>>, %arg6: memref<8x128xf32, #tpu.memory_space<vmem>>) attributes {dimension_semantics = [#tpu.dimension_semantics<parallel>], iteration_bounds = array<i64: 2>, scalar_prefetch = 0 : i64, scratch_operands = 0 : i64, tpu.core_type = #tpu.core_type<tc>, window_params = [{transform_indices = @transform_0, window_bounds = array<i64: 8, 128>}, {pipeline_mode = #tpu.pipeline_mode<synchronous>, transform_indices = @transform_1, window_bounds = array<i64: 128, 128>}, {pipeline_mode = #tpu.pipeline_mode<synchronous>, transform_indices = @transform_2, window_bounds = array<i64: 1, 128>}, {pipeline_mode = #tpu.pipeline_mode<synchronous>, transform_indices = @transform_3, window_bounds = array<i64: 128, 128>}, {pipeline_mode = #tpu.pipeline_mode<synchronous>, transform_indices = @transform_4, window_bounds = array<i64: 1, 128>}, {transform_indices = @transform_5, window_bounds = array<i64: 8, 128>}]} {
    %c0 = arith.constant 0 : index
    %c0_0 = arith.constant 0 : index
    %0 = vector.load %arg2[%c0, %c0_0] : memref<128x128xf32, #tpu.memory_space<vmem>>, vector<128x128xf32>
    %c0_1 = arith.constant 0 : index
    %c0_2 = arith.constant 0 : index
    %1 = vector.load %arg1[%c0_1, %c0_2] : memref<8x128xf32, #tpu.memory_space<vmem>>, vector<8x128xf32>
    %cst = arith.constant dense<0.000000e+00> : vector<8x128xf32>
    %2 = tpu.matmul %1, %0, %cst {dimension_numbers = #tpu.dot_dimension_numbers<[1], [0], [0], [1], [0, 0, 1, 1], [], []>} : vector<8x128xf32>, vector<128x128xf32>, vector<8x128xf32> -> vector<8x128xf32>
    %c0_3 = arith.constant 0 : index
    %c0_4 = arith.constant 0 : index
    %3 = vector.load %arg3[%c0_3, %c0_4] : memref<1x128xf32, #tpu.memory_space<vmem>>, vector<1x128xf32>
    %4 = vector.broadcast %3 : vector<1x128xf32> to vector<8x128xf32>
    %5 = arith.addf %2, %4 : vector<8x128xf32>
    %cst_5 = arith.constant 0.000000e+00 : f32
    %6 = vector.broadcast %cst_5 : f32 to vector<8x128xf32>
    %7 = arith.maximumf %5, %6 : vector<8x128xf32>
    %c0_6 = arith.constant 0 : index
    %c0_7 = arith.constant 0 : index
    %8 = vector.load %arg4[%c0_6, %c0_7] : memref<128x128xf32, #tpu.memory_space<vmem>>, vector<128x128xf32>
    %cst_8 = arith.constant dense<0.000000e+00> : vector<8x128xf32>
    %9 = tpu.matmul %7, %8, %cst_8 {dimension_numbers = #tpu.dot_dimension_numbers<[1], [0], [0], [1], [0, 0, 1, 1], [], []>} : vector<8x128xf32>, vector<128x128xf32>, vector<8x128xf32> -> vector<8x128xf32>
    %c0_9 = arith.constant 0 : index
    %c0_10 = arith.constant 0 : index
    %10 = vector.load %arg5[%c0_9, %c0_10] : memref<1x128xf32, #tpu.memory_space<vmem>>, vector<1x128xf32>
    %11 = vector.broadcast %10 : vector<1x128xf32> to vector<8x128xf32>
    %12 = arith.addf %9, %11 : vector<8x128xf32>
    %cst_11 = arith.constant 0.000000e+00 : f32
    %13 = vector.broadcast %cst_11 : f32 to vector<8x128xf32>
    %14 = arith.subf %13, %12 : vector<8x128xf32>
    %15 = math.exp %14 : vector<8x128xf32>
    %cst_12 = arith.constant 1.000000e+00 : f32
    %16 = vector.broadcast %cst_12 : f32 to vector<8x128xf32>
    %17 = arith.addf %16, %15 : vector<8x128xf32>
    %18 = tpu.reciprocal %17 : vector<8x128xf32> -> vector<8x128xf32>
    %cst_13 = arith.constant 2.000000e+00 : f32
    %19 = vector.broadcast %cst_13 : f32 to vector<8x128xf32>
    %20 = arith.mulf %19, %18 : vector<8x128xf32>
    %c0_14 = arith.constant 0 : index
    %c0_15 = arith.constant 0 : index
    %21 = vector.load %arg6[%c0_14, %c0_15] : memref<8x128xf32, #tpu.memory_space<vmem>>, vector<8x128xf32>
    tpu.vector_store %arg6[%c0_14, %c0_15], %20 {strides = array<i32>} : memref<8x128xf32, #tpu.memory_space<vmem>>, vector<8x128xf32>,
    return
  }
  func.func @transform_0(%arg0: i32) -> (i32, i32) {
    %c0_i32 = arith.constant 0 : i32
    %c0_i32_0 = arith.constant 0 : i32
    return %arg0, %c0_i32 : i32, i32
  }
  func.func @transform_1(%arg0: i32) -> (i32, i32) {
    %c0_i32 = arith.constant 0 : i32
    %c0_i32_0 = arith.constant 0 : i32
    %c0_i32_1 = arith.constant 0 : i32
    return %c0_i32, %c0_i32_0 : i32, i32
  }
  func.func @transform_2(%arg0: i32) -> (i32, i32) {
    %c0_i32 = arith.constant 0 : i32
    %c0_i32_0 = arith.constant 0 : i32
    %c0_i32_1 = arith.constant 0 : i32
    return %c0_i32, %c0_i32_0 : i32, i32
  }
  func.func @transform_3(%arg0: i32) -> (i32, i32) {
    %c0_i32 = arith.constant 0 : i32
    %c0_i32_0 = arith.constant 0 : i32
    %c0_i32_1 = arith.constant 0 : i32
    return %c0_i32, %c0_i32_0 : i32, i32
  }
  func.func @transform_4(%arg0: i32) -> (i32, i32) {
    %c0_i32 = arith.constant 0 : i32
    %c0_i32_0 = arith.constant 0 : i32
    %c0_i32_1 = arith.constant 0 : i32
    return %c0_i32, %c0_i32_0 : i32, i32
  }
  func.func @transform_5(%arg0: i32) -> (i32, i32) {
    %c0_i32 = arith.constant 0 : i32
    %c0_i32_0 = arith.constant 0 : i32
    return %arg0, %c0_i32 : i32, i32
  }
}

</mosaic_0001>

<bundles_post_ra>
// kernel: tpu_custom_call.1
= control target key start
LH: loop header
LB: loop body
LE: loop exit
PB: predicated region body
PF: predicated region fallthrough
CT: control target
= control target key end

     0   :  { %10 = vsyncpa [#allocation3], 0  ;;  %s1268_s0 = inlined_call_operand.hbm [shape: f32[16,128], index: 0, kind: input, shape index: {}]   ;;  %s1269_s1 = inlined_call_operand.hbm [shape: f32[128,128], index: 1, kind: input, shape index: {}]   ;;  %s1270_s2 = inlined_call_operand.vmem [shape: f32[1,128], index: 2, kind: input, shape index: {}]   ;;  %s1271_s3 = inlined_call_operand.hbm [shape: f32[128,128], index: 3, kind: input, shape index: {}]   ;;  %s1272_s4 = inlined_call_operand.vmem [shape: f32[1,128], index: 4, kind: input, shape index: {}]   ;;  %s1273_s5 = inlined_call_operand.hbm [shape: f32[16,128], index: 5, kind: output, shape index: {}]  }
   0x1   :  { %12 = vsyncpa [#allocation3 + $0x1], 0 }
   0x2   :  { %13 = vsyncpa [#allocation6], 0 }
   0x3   :  { %14 = vsyncpa [#allocation4], 0 }
   0x4   :  { %16 = vsyncpa [#allocation4 + $0x1], 0  ;;  %s1010_s18 = smov 0   ;;  %s1012_s19 = smov 0  }
   0x5   :  { %s1014_s20 = smov 0   ;;  %s1016_s21 = smov 0  }
   0x6 LB: > { %s1031_s22 = sadd.s32 4294967295, %s969_s21   ;;  %s567_s23 = sadd.s32 4294967294, %s969_s21   ;;  %s969_s21 = sphi %s1016_s21, %s1293_s21   ;;  %s965_s20 = sphi %s1014_s20, %s1292_s20   ;;  %s961_s19 = sphi %s1012_s19, %s1291_s19   ;;  %s957_s18 = sphi %s1010_s18, %s1290_s18  }
   0x7   : > { %p42_p0 = scmp.ne.s32.totalorder %s961_s19, %s957_s18  ;;  %p1274_p1 = scmp.eq.s32.totalorder %s1031_s22, 0 }
   0x8   : > { %p156_p3 = scmp.eq.s32.totalorder %s567_s23, 1  ;;  %p568_p5 = scmp.ge.s32.totalorder %s969_s21, 1 }
   0x9   : > { %p1040_p4 = por %p1274_p1, %p42_p0  ;;  %p163_p7 = scmp.lt.s32.totalorder %s969_s21, 3 }
   0xa   : > { %p1045_p6 = por %p156_p3, %p42_p0  ;;  %s971_s27 = smov [#allocation5]  }
   0xb   : > { %s1277_s24 = scalar_select %p1040_p4, 1, 0 }
   0xc   : > { %s1278_s25 = scalar_select %p1045_p6, 1, 0 }
   0xd   : > { %p1050_p8 = pnand %p568_p5, %p163_p7  ;;  %s175_s28 = sshll.u32 %s971_s27, 4  ;;  %s1054_s28 = int_to_ptr.vmem [resolvable:$true] %s175_s28 }
   0xe   : > { %s972_s30 = smov [#allocation7]   ;;  %s813_s9 = scalar_lea.hbm %s1269_s1, 2048 }
   0xf   : > { %p749_p9 = pneg %p1050_p8  ;;  %s191_s6 = sshll.u32 %s972_s30, 4  ;;  %s1065_s6 = int_to_ptr.vmem [resolvable:$true] %s191_s6 }
  0x10   : > { %p814_p12 = scmp.ne.s32.totalorder %s1269_s1, %s813_s9  ;;  %p820_p5 = scmp.lt.u32.totalorder %s813_s9, %s1269_s1 }
  0x11   : > { %p1061_p11 = pnand %p749_p9, %p1274_p1 }
  0x13   : > { %p815_p13 = pneg %p1061_p11 }
  0x15   : > { %p816_p0 = pnand %p815_p13, %p814_p12 }
  0x17   : > { %p817_p3 = pneg %p816_p0 }
  0x19   : > { %p822_p7 = pnand %p820_p5, %p817_p3 }
  0x1b   : > { %825 = shalt.err (!%p822_p7)
}
  0x1c   : > { %s826_s14 = scalar_lea.vmem %s1054_s28, 2048  ;;  %p834_p2 = scmp.lt.s32.totalorder %s1054_s28, %s1054_s28 }
  0x1d   : > { %p827_p9 = scmp.ne.s32.totalorder %s1054_s28, %s826_s14  ;;  %p835_p12 = scmp.lt.s32.totalorder %s826_s14, %s826_s14 }
  0x1f   : > { %p829_p10 = pnand %p827_p9, %p815_p13  ;;  %p836_p0 = por %p835_p12, %p834_p2 }
  0x21   : > { %p830_p1 = pneg %p829_p10 }
  0x23   : > { %p837_p6 = pnand %p836_p0, %p830_p1 }
  0x25   : > { %840 = shalt.err (!%p837_p6)
}
  0x26   : > { %s973_s15 = smov 128   ;;  %s974_s16 = smov 8  }
  0x27   : > { %752 = dma.hbm_to_vmem [thread:$0]  (!%p1061_p11), %s1269_s1, 2048, %s1054_s28, [#allocation6], %s973_s15, %s973_s15, %s974_s16  }
  0x28   : > { %s841_s7 = scalar_lea.hbm %s1271_s3, 2048 }
  0x29   : > { %p842_p2 = scmp.ne.s32.totalorder %s1271_s3, %s841_s7  ;;  %p848_p10 = scmp.lt.u32.totalorder %s841_s7, %s1271_s3 }
  0x2b   : > { %p844_p1 = pnand %p842_p2, %p815_p13 }
  0x2d   : > { %p845_p6 = pneg %p844_p1 }
  0x2f   : > { %p850_p3 = pnand %p848_p10, %p845_p6 }
  0x31   : > { %853 = shalt.err (!%p850_p3)
}
  0x32   : > { %s854_s28 = scalar_lea.vmem %s1065_s6, 2048  ;;  %p862_p12 = scmp.lt.s32.totalorder %s1065_s6, %s1065_s6 }
  0x33   : > { %p855_p5 = scmp.ne.s32.totalorder %s1065_s6, %s854_s28  ;;  %p863_p0 = scmp.lt.s32.totalorder %s854_s28, %s854_s28 }
  0x35   : > { %p857_p7 = pnand %p855_p5, %p815_p13  ;;  %p864_p2 = por %p863_p0, %p862_p12 }
  0x37   : > { %p858_p9 = pneg %p857_p7 }
  0x39   : > { %p865_p1 = pnand %p864_p2, %p858_p9 }
  0x3b   : > { %868 = shalt.err (!%p865_p1)
}
  0x3c   : > { %755 = dma.hbm_to_vmem [thread:$0]  (!%p1061_p11), %s1271_s3, 2048, %s1065_s6, [#allocation6], %s973_s15, %s973_s15, %s974_s16  }
  0x3d   : > { %s1120_s14 = sadd.s32 1, %s969_s21   ;;  %s29_s29 = sadd.s32 1, %s965_s20 }
  0x3e   : > { %s26_s17 = ssub.s32 %s969_s21, %s1120_s14  ;;  %p36_p13 = scmp.ne.s32.totalorder %s965_s20, %s961_s19 }
  0x3f   : > { %p27_p6 = scmp.eq.s32.totalorder %s26_s17, 0  ;;  %p37_p10 = scmp.eq.s32.totalorder %s969_s21, 0 }
  0x40   : > { %p1281_p3 = scmp.eq.s32.totalorder %s1031_s22, 1  ;;  %p766_p7 = scmp.lt.s32.totalorder %s969_s21, 2 }
  0x41   : > { %s1136_s27 = scalar_select %p27_p6, %s965_s20, %s29_s29  }
  0x42   : > { %p1130_p5 = por %p1281_p3, %p36_p13  ;;  %p38_p9 = por %p37_p10, %p36_p13 }
  0x43   : > { %s208_s30 = sand.u32 1, %s965_s20   ;;  %s573_s6 = sshll.u32 %s969_s21, 7 }
  0x44   : > { %s1282_s23 = scalar_select %p1130_p5, 1, 0 }
  0x45   : > { %s572_s7 = sshll.u32 %s208_s30, 3  ;;  %s1143_s8 = scalar_lea.hbm %s1268_s0, %s573_s6 }
  0x46   : > { %s212_s9 = scalar_lea.vmem [#allocation2], %s572_s7  ;;  %p1147_p11 = pnand %p766_p7, %p38_p9 }
  0x47   : > { %s219_s10 = sshll.u32 %s212_s9, 4  ;;  %s209_s28 = scalar_lea.sflag [#allocation3], %s208_s30  ;;  %s1145_s10 = int_to_ptr.vmem [resolvable:$true] %s219_s10 }
  0x48   : > { %s869_s12 = scalar_lea.hbm %s1143_s8, 128  ;;  %p871_p0 = pneg %p1147_p11 }
  0x49   : > { %p870_p12 = scmp.ne.s32.totalorder %s1143_s8, %s869_s12  ;;  %s874_s17 = scalar_lea.hbm %s1268_s0, 256 }
  0x4a   : > { %p875_p13 = scmp.lt.u32.totalorder %s1143_s8, %s1268_s0  ;;  %p876_p6 = scmp.lt.u32.totalorder %s874_s17, %s869_s12 }
  0x4b   : > { %p872_p2 = pnand %p871_p0, %p870_p12  ;;  %p878_p3 = scmp.lt.u32.totalorder %s869_s12, %s1143_s8 }
  0x4c   : > { %p877_p10 = por %p876_p6, %p875_p13 }
  0x4d   : > { %p873_p1 = pneg %p872_p2 }
  0x4e   : > { %p879_p7 = por %p878_p3, %p877_p10 }
  0x50   : > { %p880_p9 = pnand %p879_p7, %p873_p1 }
  0x52   : > { %883 = shalt.err (!%p880_p9)
}
  0x53   : > { %s884_s30 = scalar_lea.vmem %s1145_s10, 128  ;;  %s975_s15 = smov [#allocation2]  }
  0x54   : > { %p885_p12 = scmp.ne.s32.totalorder %s1145_s10, %s884_s30  ;;  %s889_s16 = sshll.u32 %s975_s15, 4  ;;  %s890_s16 = int_to_ptr.vmem [resolvable:$false] %s889_s16 }
  0x55   : > { %s891_s9 = scalar_lea.vmem %s890_s16, 256  ;;  %p892_p4 = scmp.lt.s32.totalorder %s1145_s10, %s890_s16 }
  0x56   : > { %p887_p2 = pnand %p885_p12, %p871_p0  ;;  %p893_p13 = scmp.lt.s32.totalorder %s891_s9, %s884_s30 }
  0x58   : > { %p888_p5 = pneg %p887_p2  ;;  %p894_p6 = por %p893_p13, %p892_p4 }
  0x5a   : > { %p895_p10 = pnand %p894_p6, %p888_p5 }
  0x5c   : > { %898 = shalt.err (!%p895_p10)
}
  0x5d   : > { %759 = dma.hbm_to_vmem [thread:$0]  (!%p1147_p11), %s1143_s8, 128, %s1145_s10, %s209_s28  }
  0x5e   : > { %228 = sbr.rel (%p1050_p8) target bundleno = 613 (0x265), region = 40  ;;  %s1179_s12 = sand.u32 (!%p1050_p8), 1, %s961_s19  }
  0x5f   : > { %s575_s13 = sshll.u32 (!%p1050_p8), %s1179_s12, 3  ;;  %s231_s29 = scalar_lea.sflag (!%p1050_p8), [#allocation3], %s1179_s12 }
  0x60   : > { %s1185_s17 = scalar_lea.vmem (!%p1050_p8), [#allocation2], %s575_s13  ;;  %p1284_p4 = scmp.ne.s32.totalorder (!%p1050_p8), %s1277_s24, 0 }
  0x65   : > { %944 = dma.done.wait (%p1284_p4), %s231_s29, 128  }
  0x66   : > { %946 = vsyncadd (%p1284_p4), %s231_s29, 4294967168  ;;  %p1285_p5 = scmp.eq.s32.totalorder %s1031_s22, 0 }
  0x68   : > { %948 = dma.done.wait (%p1285_p5), [#allocation6], 4096   ;;  %p1286_p8 = pmov %p1285_p5 }
  0x69   : > { %v976_v0 = vmov 0.0|0.0   ;;  %vm977_vm0 = vmmov 0   ;;  %v978_v1 = vmov 0.0   ;;  %v269_v2 = vld [vmem:[#allocation5] sm:$0xff]  ;;  %v270_v3 = vld [vmem:[#allocation5 + $0x8] sm:$0xff]  ;;  %v271_v4 = vld [vmem:[#allocation5 + $0x10] sm:$0xff] }
  0x6a   : > { %950 = vsyncadd (%p1286_p8), [#allocation6], 4294963200  ;;  %689 = vmatprep.subr.bf16.mxu0 %v976_v0  ;;  %651 = vmatprep.mubr.msk.f32.mxu0 %vm977_vm0, %v978_v1  ;;  %v690_v5 = vpack.c.bf16 %v270_v3, %v269_v2  ;;  %v272_v6 = vld [vmem:[#allocation5 + $0x18] sm:$0xff]  ;;  %v273_v8 = vld [vmem:[#allocation5 + $0x20] sm:$0xff]  ;;  %s582_s11 = sshll.u32 %s1031_s22, 7  ;;  %s268_s28 = scalar_lea.vmem [#allocation8], %s575_s13 }
  0x6b   : > { %713 = vmatprep.subr.bf16.mxu1 %v976_v0  ;;  %686 = vmatprep.mubr.msk.f32.mxu1 %vm977_vm0, %v978_v1  ;;  %v693_v7 = vpack.c.bf16 %v272_v6, %v271_v4  ;;  %v274_v9 = vld [vmem:[#allocation5 + $0x28] sm:$0xff]  ;;  %v364_v10 = vld [vmem:[#allocation7] sm:$0xff]  ;;  %v366_v12 = vld [vmem:[#allocation7 + $0x10] sm:$0xff]  ;;  %s478_s7 = sshll.u32 %s268_s28, 4  ;;  %s1224_s15 = scalar_lea.hbm %s1273_s5, %s582_s11  ;;  %s1226_s7 = int_to_ptr.vmem [resolvable:$true] %s478_s7 }
  0x6c   : > { %691 = vmatpush3.bf16.msra.mxu0 %v690_v5  ;;  %v365_v11 = vld [vmem:[#allocation7 + $0x8] sm:$0xff]  ;;  %v367_v13 = vld [vmem:[#allocation7 + $0x18] sm:$0xff]  ;;  %v696_v14 = vpack.c.bf16 %v274_v9, %v273_v8  ;;  %v275_v16 = vld [vmem:[#allocation5 + $0x30] sm:$0xff]  ;;  %s465_s16 = scalar_lea.sflag [#allocation4], %s1179_s12  ;;  %s899_s9 = scalar_lea.vmem %s1226_s7, 128 }
  0x6d   : > { %692 = vmatprep.subr.bf16.mxu0 %v976_v0  ;;  %v714_v15 = vpack.c.bf16 %v365_v11, %v364_v10  ;;  %v276_v17 = vld [vmem:[#allocation5 + $0x38] sm:$0xff]  ;;  %v717_v18 = vpack.c.bf16 %v367_v13, %v366_v12  ;;  %v368_v19 = vld [vmem:[#allocation7 + $0x20] sm:$0xff]  ;;  %v369_v20 = vld [vmem:[#allocation7 + $0x28] sm:$0xff]  ;;  %p900_p11 = scmp.ne.s32.totalorder %s1226_s7, %s899_s9  ;;  %p1287_p0 = scmp.ne.s32.totalorder %s1282_s23, 0 }
  0x6e   : > { %v699_v21 = vpack.c.bf16 %v276_v17, %v275_v16  ;;  %v277_v22 = vld [vmem:[#allocation5 + $0x40] sm:$0xff]  ;;  %v278_v23 = vld [vmem:[#allocation5 + $0x48] sm:$0xff]  ;;  %v720_v24 = vpack.c.bf16 %v369_v20, %v368_v19  ;;  %v370_v25 = vld [vmem:[#allocation7 + $0x30] sm:$0xff]  ;;  %s979_s22 = smov [#allocation8]  }
  0x6f   : > { %715 = vmatpush3.bf16.msra.mxu1 %v714_v15  ;;  %v371_v26 = vld [vmem:[#allocation7 + $0x38] sm:$0xff]  ;;  %v702_v27 = vpack.c.bf16 %v278_v23, %v277_v22  ;;  %v279_v28 = vld [vmem:[#allocation5 + $0x50] sm:$0xff]  ;;  %v372_v31 = vld [vmem:[#allocation7 + $0x40] sm:$0xff]  ;;  %p901_p1 = pnand %p900_p11, %p1287_p0  ;;  %s903_s13 = sshll.u32 %s979_s22, 4  ;;  %s904_s13 = int_to_ptr.vmem [resolvable:$false] %s903_s13 }
  0x70   : > { %694 = vmatpush3.bf16.msra.mxu0 %v693_v7  ;;  %716 = vmatprep.subr.bf16.mxu1 %v976_v0  ;;  %v280_v29 = vld [vmem:[#allocation5 + $0x58] sm:$0xff]  ;;  %v723_v30 = vpack.c.bf16 %v371_v26, %v370_v25  ;;  %v373_v32 = vld [vmem:[#allocation7 + $0x48] sm:$0xff]  ;;  %v281_v34 = vld [vmem:[#allocation5 + $0x60] sm:$0xff]  ;;  %s905_s29 = scalar_lea.vmem %s904_s13, 256  ;;  %p906_p7 = scmp.lt.s32.totalorder %s1226_s7, %s904_s13 }
  0x71   : > { %695 = vmatprep.subr.bf16.mxu0 %v976_v0  ;;  %v705_v33 = vpack.c.bf16 %v280_v29, %v279_v28  ;;  %v282_v35 = vld [vmem:[#allocation5 + $0x68] sm:$0xff]  ;;  %v726_v36 = vpack.c.bf16 %v373_v32, %v372_v31  ;;  %v374_v37 = vld [vmem:[#allocation7 + $0x50] sm:$0xff]  ;;  %v375_v38 = vld [vmem:[#allocation7 + $0x58] sm:$0xff]  ;;  %p902_p3 = pneg %p901_p1  ;;  %p907_p9 = scmp.lt.s32.totalorder %s905_s29, %s899_s9 }
  0x72   : > { %v708_v39 = vpack.c.bf16 %v282_v35, %v281_v34  ;;  %v283_v40 = vld [vmem:[#allocation5 + $0x70] sm:$0xff]  ;;  %v284_v41 = vld [vmem:[#allocation5 + $0x78] sm:$0xff]  ;;  %v729_v42 = vpack.c.bf16 %v375_v38, %v374_v37  ;;  %v376_v43 = vld [vmem:[#allocation7 + $0x60] sm:$0xff] }
  0x73   : > { %718 = vmatpush3.bf16.msra.mxu1 %v717_v18  ;;  %v377_v44 = vld [vmem:[#allocation7 + $0x68] sm:$0xff]  ;;  %v711_v45 = vpack.c.bf16 %v284_v41, %v283_v40  ;;  %v285_v47 = vld [vmem:[%s1185_s17] sm:$0xff]  ;;  %p908_p12 = por %p907_p9, %p906_p7 }
  0x74   : > { %697 = vmatpush3.bf16.msra.mxu0 %v696_v14  ;;  %719 = vmatprep.subr.bf16.mxu1 %v976_v0  ;;  %v732_v46 = vpack.c.bf16 %v377_v44, %v376_v43  ;;  %v378_v48 = vld [vmem:[#allocation7 + $0x70] sm:$0xff]  ;;  %v379_v49 = vld [vmem:[#allocation7 + $0x78] sm:$0xff] }
  0x75   : > { %698 = vmatprep.subr.bf16.mxu0 %v976_v0  ;;  %v735_v50 = vpack.c.bf16 %v379_v49, %v378_v48  ;;  %v579_v51 = vld [vmem:[%s1270_s2] ss:$0 sm:$0xff]  ;;  %p909_p2 = pnand %p908_p12, %p902_p3 }
  0x76   : > { %v580_v56 = vld [vmem:[%s1272_s4] ss:$0 sm:$0xff] }
  0x77   : > { %721 = vmatpush3.bf16.msra.mxu1 %v720_v24 }
  0x78   : > { %700 = vmatpush3.bf16.msra.mxu0 %v699_v21  ;;  %722 = vmatprep.subr.bf16.mxu1 %v976_v0 }
  0x79   : > { %701 = vmatprep.subr.bf16.mxu0 %v976_v0 }
  0x7b   : > { %724 = vmatpush3.bf16.msra.mxu1 %v723_v30 }
  0x7c   : > { %703 = vmatpush3.bf16.msra.mxu0 %v702_v27  ;;  %725 = vmatprep.subr.bf16.mxu1 %v976_v0 }
  0x7d   : > { %704 = vmatprep.subr.bf16.mxu0 %v976_v0 }
  0x7f   : > { %727 = vmatpush3.bf16.msra.mxu1 %v726_v36 }
  0x80   : > { %706 = vmatpush3.bf16.msra.mxu0 %v705_v33  ;;  %728 = vmatprep.subr.bf16.mxu1 %v976_v0 }
  0x81   : > { %707 = vmatprep.subr.bf16.mxu0 %v976_v0 }
  0x83   : > { %730 = vmatpush3.bf16.msra.mxu1 %v729_v42 }
  0x84   : > { %709 = vmatpush3.bf16.msra.mxu0 %v708_v39  ;;  %731 = vmatprep.subr.bf16.mxu1 %v976_v0 }
  0x85   : > { %710 = vmatprep.subr.bf16.mxu0 %v976_v0 }
  0x87   : > { %733 = vmatpush3.bf16.msra.mxu1 %v732_v46 }
  0x88   : > { %712 = vmatpush3.bf16.msra.mxu0 %v711_v45  ;;  %734 = vmatprep.subr.bf16.mxu1 %v976_v0 }
  0x8b   : > { %652 = vmatmul.mubr.f32.vlgmr.msra.gmra.mrb[0].mxu0 %v285_v47  ;;  %736 = vmatpush3.bf16.msra.mxu1 %v735_v50 }
 0x15e   : > { %v359_v52 = vpop.f32.mrb[0].mxu0 }
 0x15f   : > { %v360_v53 = vadd.f32 %v579_v51, %v359_v52  ;;  %v653_v54 = vpop.f32.mrb[1].mxu0 }
 0x161   : > { %v363_v55 = vmax.f32 %v360_v53, 0.0 }
 0x163   : > { %687 = vmatmul.mubr.f32.vlgmr.msra.gmra.mrb[0].mxu1 %v363_v55 }
 0x236   : > { %v453_v57 = vpop.f32.mrb[0].mxu1 }
 0x237   : > { %v454_v58 = vadd.f32 %v580_v56, %v453_v57  ;;  %v688_v59 = vpop.f32.mrb[1].mxu1 }
 0x239   : > { %v457_v60 = vsub.f32 0.0, %v454_v58 }
 0x23b   : > { %v458_v61 = vmul.f32 1.442695, %v457_v60 }
 0x23d   : > { %809 = vpow2.f32 %v458_v61 }
 0x247   : > { %v810_v62 = vpop.eup %809 }
 0x248   : > { %v460_v63 = vadd.f32 1.0, %v810_v62 }
 0x24a   : > { %811 = vrcp.f32 %v460_v63 }
 0x254   : > { %v812_v0 = vpop.eup %811 }
 0x255   : > { %v462_v1 = vmul.f32 2.0, %v812_v0 }
 0x257   : > { %463 = vst [vmem:[%s268_s28] sm:$0xff] %v462_v1 }
 0x258   : > { %912 = shalt.err (!%p909_p2)
}
 0x259   : > { %s913_s12 = scalar_lea.hbm %s1224_s15, 128  ;;  %s917_s26 = scalar_lea.hbm %s1273_s5, 256 }
 0x25a   : > { %p914_p13 = scmp.ne.s32.totalorder %s1224_s15, %s913_s12  ;;  %p918_p4 = scmp.lt.u32.totalorder %s1224_s15, %s1273_s5 }
 0x25b   : > { %p919_p5 = scmp.lt.u32.totalorder %s917_s26, %s913_s12  ;;  %p921_p11 = scmp.lt.u32.totalorder %s913_s12, %s1224_s15 }
 0x25c   : > { %p915_p6 = pnand %p914_p13, %p1287_p0 }
 0x25d   : > { %p920_p8 = por %p919_p5, %p918_p4 }
 0x25e   : > { %p916_p10 = pneg %p915_p6 }
 0x25f   : > { %p922_p1 = por %p921_p11, %p920_p8 }
 0x261   : > { %p923_p3 = pnand %p922_p1, %p916_p10 }
 0x263   : > { %926 = shalt.err (!%p923_p3)
}
 0x264   : > { %747 = dma.vmem_to_hbm [thread:$0]  (%p1287_p0), %s1226_s7, 128, %s1224_s15, %s465_s16  }
 0x265 PF: > { %s490_s11 = sand.u32 1, %s957_s18   ;;  %p1288_p7 = scmp.ne.s32.totalorder %s1278_s25, 0 }
 0x266   : > { %p1289_p9 = scmp.ge.s32.totalorder %s969_s21, 2  ;;  %s491_s28 = scalar_lea.sflag [#allocation4], %s490_s11 }
 0x268   : > { %p761_p12 = pnand %p1289_p9, %p1288_p7 }
 0x26a   : > { %952 = dma.done.wait (!%p761_p12), %s491_s28, 128  }
 0x26b   : > { %954 = vsyncadd (!%p761_p12), %s491_s28, 4294967168  ;;  %p19_p2 = scmp.ge.s32.totalorder %s1120_s14, 4   ;;  %s1290_s18 = smov %s961_s19 }
 0x26c   : > { %s1291_s19 = smov %s965_s20  ;;  %s1292_s20 = smov %s1136_s27 }
 0x26d   : > { %s1293_s21 = smov %s1120_s14  ;;  %21 = sbr.rel (!%p19_p2) target bundleno = 6 (0x6), region = 93 }
 0x274   :  { %496 = vsyncpa [#allocation3], 1 }
 0x275   :  { %498 = vsyncpa [#allocation3 + $0x1], 1 }
 0x276   :  { %499 = vsyncpa [#allocation6], 1 }
 0x277   :  { %500 = vsyncpa [#allocation4], 1 }
 0x278   :  { %502 = vsyncpa [#allocation4 + $0x1], 1 }

// kernel: tpu_custom_call.1
= control target key start
LH: loop header
LB: loop body
LE: loop exit
PB: predicated region body
PF: predicated region fallthrough
CT: control target
= control target key end

     0   :  { %10 = vsyncpa [#allocation3], 0  ;;  %s1268_s0 = inlined_call_operand.hbm [shape: f32[16,128], index: 0, kind: input, shape index: {}]   ;;  %s1269_s1 = inlined_call_operand.hbm [shape: f32[128,128], index: 1, kind: input, shape index: {}]   ;;  %s1270_s2 = inlined_call_operand.vmem [shape: f32[1,128], index: 2, kind: input, shape index: {}]   ;;  %s1271_s3 = inlined_call_operand.hbm [shape: f32[128,128], index: 3, kind: input, shape index: {}]   ;;  %s1272_s4 = inlined_call_operand.vmem [shape: f32[1,128], index: 4, kind: input, shape index: {}]   ;;  %s1273_s5 = inlined_call_operand.hbm [shape: f32[16,128], index: 5, kind: output, shape index: {}]  }
   0x1   :  { %12 = vsyncpa [#allocation3 + $0x1], 0 }
   0x2   :  { %13 = vsyncpa [#allocation6], 0 }
   0x3   :  { %14 = vsyncpa [#allocation4], 0 }
   0x4   :  { %16 = vsyncpa [#allocation4 + $0x1], 0  ;;  %s1010_s18 = smov 0   ;;  %s1012_s19 = smov 0  }
   0x5   :  { %s1014_s20 = smov 0   ;;  %s1016_s21 = smov 0  }
   0x6 LB: > { %s1031_s22 = sadd.s32 4294967295, %s969_s21   ;;  %s567_s23 = sadd.s32 4294967294, %s969_s21   ;;  %s969_s21 = sphi %s1016_s21, %s1293_s21   ;;  %s965_s20 = sphi %s1014_s20, %s1292_s20   ;;  %s961_s19 = sphi %s1012_s19, %s1291_s19   ;;  %s957_s18 = sphi %s1010_s18, %s1290_s18  }
   0x7   : > { %p42_p0 = scmp.ne.s32.totalorder %s961_s19, %s957_s18  ;;  %p1274_p1 = scmp.eq.s32.totalorder %s1031_s22, 0 }
   0x8   : > { %p156_p3 = scmp.eq.s32.totalorder %s567_s23, 1  ;;  %p568_p5 = scmp.ge.s32.totalorder %s969_s21, 1 }
   0x9   : > { %p1040_p4 = por %p1274_p1, %p42_p0  ;;  %p163_p7 = scmp.lt.s32.totalorder %s969_s21, 3 }
   0xa   : > { %p1045_p6 = por %p156_p3, %p42_p0  ;;  %s971_s27 = smov [#allocation5]  }
   0xb   : > { %s1277_s24 = scalar_select %p1040_p4, 1, 0 }
   0xc   : > { %s1278_s25 = scalar_select %p1045_p6, 1, 0 }
   0xd   : > { %p1050_p8 = pnand %p568_p5, %p163_p7  ;;  %s175_s28 = sshll.u32 %s971_s27, 4  ;;  %s1054_s28 = int_to_ptr.vmem [resolvable:$true] %s175_s28 }
   0xe   : > { %s972_s30 = smov [#allocation7]   ;;  %s813_s9 = scalar_lea.hbm %s1269_s1, 2048 }
   0xf   : > { %p749_p9 = pneg %p1050_p8  ;;  %s191_s6 = sshll.u32 %s972_s30, 4  ;;  %s1065_s6 = int_to_ptr.vmem [resolvable:$true] %s191_s6 }
  0x10   : > { %p814_p12 = scmp.ne.s32.totalorder %s1269_s1, %s813_s9  ;;  %p820_p5 = scmp.lt.u32.totalorder %s813_s9, %s1269_s1 }
  0x11   : > { %p1061_p11 = pnand %p749_p9, %p1274_p1 }
  0x13   : > { %p815_p13 = pneg %p1061_p11 }
  0x15   : > { %p816_p0 = pnand %p815_p13, %p814_p12 }
  0x17   : > { %p817_p3 = pneg %p816_p0 }
  0x19   : > { %p822_p7 = pnand %p820_p5, %p817_p3 }
  0x1b   : > { %825 = shalt.err (!%p822_p7)
}
  0x1c   : > { %s826_s14 = scalar_lea.vmem %s1054_s28, 2048  ;;  %p834_p2 = scmp.lt.s32.totalorder %s1054_s28, %s1054_s28 }
  0x1d   : > { %p827_p9 = scmp.ne.s32.totalorder %s1054_s28, %s826_s14  ;;  %p835_p12 = scmp.lt.s32.totalorder %s826_s14, %s826_s14 }
  0x1f   : > { %p829_p10 = pnand %p827_p9, %p815_p13  ;;  %p836_p0 = por %p835_p12, %p834_p2 }
  0x21   : > { %p830_p1 = pneg %p829_p10 }
  0x23   : > { %p837_p6 = pnand %p836_p0, %p830_p1 }
  0x25   : > { %840 = shalt.err (!%p837_p6)
}
  0x26   : > { %s973_s15 = smov 128   ;;  %s974_s16 = smov 8  }
  0x27   : > { %752 = dma.hbm_to_vmem [thread:$0]  (!%p1061_p11), %s1269_s1, 2048, %s1054_s28, [#allocation6], %s973_s15, %s973_s15, %s974_s16  }
  0x28   : > { %s841_s7 = scalar_lea.hbm %s1271_s3, 2048 }
  0x29   : > { %p842_p2 = scmp.ne.s32.totalorder %s1271_s3, %s841_s7  ;;  %p848_p10 = scmp.lt.u32.totalorder %s841_s7, %s1271_s3 }
  0x2b   : > { %p844_p1 = pnand %p842_p2, %p815_p13 }
  0x2d   : > { %p845_p6 = pneg %p844_p1 }
  0x2f   : > { %p850_p3 = pnand %p848_p10, %p845_p6 }
  0x31   : > { %853 = shalt.err (!%p850_p3)
}
  0x32   : > { %s854_s28 = scalar_lea.vmem %s1065_s6, 2048  ;;  %p862_p12 = scmp.lt.s32.totalorder %s1065_s6, %s1065_s6 }
  0x33   : > { %p855_p5 = scmp.ne.s32.totalorder %s1065_s6, %s854_s28  ;;  %p863_p0 = scmp.lt.s32.totalorder %s854_s28, %s854_s28 }
  0x35   : > { %p857_p7 = pnand %p855_p5, %p815_p13  ;;  %p864_p2 = por %p863_p0, %p862_p12 }
  0x37   : > { %p858_p9 = pneg %p857_p7 }
  0x39   : > { %p865_p1 = pnand %p864_p2, %p858_p9 }
  0x3b   : > { %868 = shalt.err (!%p865_p1)
}
  0x3c   : > { %755 = dma.hbm_to_vmem [thread:$0]  (!%p1061_p11), %s1271_s3, 2048, %s1065_s6, [#allocation6], %s973_s15, %s973_s15, %s974_s16  }
  0x3d   : > { %s1120_s14 = sadd.s32 1, %s969_s21   ;;  %s29_s29 = sadd.s32 1, %s965_s20 }
  0x3e   : > { %s26_s17 = ssub.s32 %s969_s21, %s1120_s14  ;;  %p36_p13 = scmp.ne.s32.totalorder %s965_s20, %s961_s19 }
  0x3f   : > { %p27_p6 = scmp.eq.s32.totalorder %s26_s17, 0  ;;  %p37_p10 = scmp.eq.s32.totalorder %s969_s21, 0 }
  0x40   : > { %p1281_p3 = scmp.eq.s32.totalorder %s1031_s22, 1  ;;  %p766_p7 = scmp.lt.s32.totalorder %s969_s21, 2 }
  0x41   : > { %s1136_s27 = scalar_select %p27_p6, %s965_s20, %s29_s29  }
  0x42   : > { %p1130_p5 = por %p1281_p3, %p36_p13  ;;  %p38_p9 = por %p37_p10, %p36_p13 }
  0x43   : > { %s208_s30 = sand.u32 1, %s965_s20   ;;  %s573_s6 = sshll.u32 %s969_s21, 7 }
  0x44   : > { %s1282_s23 = scalar_select %p1130_p5, 1, 0 }
  0x45   : > { %s572_s7 = sshll.u32 %s208_s30, 3  ;;  %s1143_s8 = scalar_lea.hbm %s1268_s0, %s573_s6 }
  0x46   : > { %s212_s9 = scalar_lea.vmem [#allocation2], %s572_s7  ;;  %p1147_p11 = pnand %p766_p7, %p38_p9 }
  0x47   : > { %s219_s10 = sshll.u32 %s212_s9, 4  ;;  %s209_s28 = scalar_lea.sflag [#allocation3], %s208_s30  ;;  %s1145_s10 = int_to_ptr.vmem [resolvable:$true] %s219_s10 }
  0x48   : > { %s869_s12 = scalar_lea.hbm %s1143_s8, 128  ;;  %p871_p0 = pneg %p1147_p11 }
  0x49   : > { %p870_p12 = scmp.ne.s32.totalorder %s1143_s8, %s869_s12  ;;  %s874_s17 = scalar_lea.hbm %s1268_s0, 256 }
  0x4a   : > { %p875_p13 = scmp.lt.u32.totalorder %s1143_s8, %s1268_s0  ;;  %p876_p6 = scmp.lt.u32.totalorder %s874_s17, %s869_s12 }
  0x4b   : > { %p872_p2 = pnand %p871_p0, %p870_p12  ;;  %p878_p3 = scmp.lt.u32.totalorder %s869_s12, %s1143_s8 }
  0x4c   : > { %p877_p10 = por %p876_p6, %p875_p13 }
  0x4d   : > { %p873_p1 = pneg %p872_p2 }
  0x4e   : > { %p879_p7 = por %p878_p3, %p877_p10 }
  0x50   : > { %p880_p9 = pnand %p879_p7, %p873_p1 }
  0x52   : > { %883 = shalt.err (!%p880_p9)
}
  0x53   : > { %s884_s30 = scalar_lea.vmem %s1145_s10, 128  ;;  %s975_s15 = smov [#allocation2]  }
  0x54   : > { %p885_p12 = scmp.ne.s32.totalorder %s1145_s10, %s884_s30  ;;  %s889_s16 = sshll.u32 %s975_s15, 4  ;;  %s890_s16 = int_to_ptr.vmem [resolvable:$false] %s889_s16 }
  0x55   : > { %s891_s9 = scalar_lea.vmem %s890_s16, 256  ;;  %p892_p4 = scmp.lt.s32.totalorder %s1145_s10, %s890_s16 }
  0x56   : > { %p887_p2 = pnand %p885_p12, %p871_p0  ;;  %p893_p13 = scmp.lt.s32.totalorder %s891_s9, %s884_s30 }
  0x58   : > { %p888_p5 = pneg %p887_p2  ;;  %p894_p6 = por %p893_p13, %p892_p4 }
  0x5a   : > { %p895_p10 = pnand %p894_p6, %p888_p5 }
  0x5c   : > { %898 = shalt.err (!%p895_p10)
}
  0x5d   : > { %759 = dma.hbm_to_vmem [thread:$0]  (!%p1147_p11), %s1143_s8, 128, %s1145_s10, %s209_s28  }
  0x5e   : > { %228 = sbr.rel (%p1050_p8) target bundleno = 613 (0x265), region = 40  ;;  %s1179_s12 = sand.u32 (!%p1050_p8), 1, %s961_s19  }
  0x5f   : > { %s575_s13 = sshll.u32 (!%p1050_p8), %s1179_s12, 3  ;;  %s231_s29 = scalar_lea.sflag (!%p1050_p8), [#allocation3], %s1179_s12 }
  0x60   : > { %s1185_s17 = scalar_lea.vmem (!%p1050_p8), [#allocation2], %s575_s13  ;;  %p1284_p4 = scmp.ne.s32.totalorder (!%p1050_p8), %s1277_s24, 0 }
  0x65   : > { %944 = dma.done.wait (%p1284_p4), %s231_s29, 128  }
  0x66   : > { %946 = vsyncadd (%p1284_p4), %s231_s29, 4294967168  ;;  %p1285_p5 = scmp.eq.s32.totalorder %s1031_s22, 0 }
  0x68   : > { %948 = dma.done.wait (%p1285_p5), [#allocation6], 4096   ;;  %p1286_p8 = pmov %p1285_p5 }
  0x69   : > { %v976_v0 = vmov 0.0|0.0   ;;  %vm977_vm0 = vmmov 0   ;;  %v978_v1 = vmov 0.0   ;;  %v269_v2 = vld [vmem:[#allocation5] sm:$0xff]  ;;  %v270_v3 = vld [vmem:[#allocation5 + $0x8] sm:$0xff]  ;;  %v271_v4 = vld [vmem:[#allocation5 + $0x10] sm:$0xff] }
  0x6a   : > { %950 = vsyncadd (%p1286_p8), [#allocation6], 4294963200  ;;  %689 = vmatprep.subr.bf16.mxu0 %v976_v0  ;;  %651 = vmatprep.mubr.msk.f32.mxu0 %vm977_vm0, %v978_v1  ;;  %v690_v5 = vpack.c.bf16 %v270_v3, %v269_v2  ;;  %v272_v6 = vld [vmem:[#allocation5 + $0x18] sm:$0xff]  ;;  %v273_v8 = vld [vmem:[#allocation5 + $0x20] sm:$0xff]  ;;  %s582_s11 = sshll.u32 %s1031_s22, 7  ;;  %s268_s28 = scalar_lea.vmem [#allocation8], %s575_s13 }
  0x6b   : > { %713 = vmatprep.subr.bf16.mxu1 %v976_v0  ;;  %686 = vmatprep.mubr.msk.f32.mxu1 %vm977_vm0, %v978_v1  ;;  %v693_v7 = vpack.c.bf16 %v272_v6, %v271_v4  ;;  %v274_v9 = vld [vmem:[#allocation5 + $0x28] sm:$0xff]  ;;  %v364_v10 = vld [vmem:[#allocation7] sm:$0xff]  ;;  %v366_v12 = vld [vmem:[#allocation7 + $0x10] sm:$0xff]  ;;  %s478_s7 = sshll.u32 %s268_s28, 4  ;;  %s1224_s15 = scalar_lea.hbm %s1273_s5, %s582_s11  ;;  %s1226_s7 = int_to_ptr.vmem [resolvable:$true] %s478_s7 }
  0x6c   : > { %691 = vmatpush3.bf16.msra.mxu0 %v690_v5  ;;  %v365_v11 = vld [vmem:[#allocation7 + $0x8] sm:$0xff]  ;;  %v367_v13 = vld [vmem:[#allocation7 + $0x18] sm:$0xff]  ;;  %v696_v14 = vpack.c.bf16 %v274_v9, %v273_v8  ;;  %v275_v16 = vld [vmem:[#allocation5 + $0x30] sm:$0xff]  ;;  %s465_s16 = scalar_lea.sflag [#allocation4], %s1179_s12  ;;  %s899_s9 = scalar_lea.vmem %s1226_s7, 128 }
  0x6d   : > { %692 = vmatprep.subr.bf16.mxu0 %v976_v0  ;;  %v714_v15 = vpack.c.bf16 %v365_v11, %v364_v10  ;;  %v276_v17 = vld [vmem:[#allocation5 + $0x38] sm:$0xff]  ;;  %v717_v18 = vpack.c.bf16 %v367_v13, %v366_v12  ;;  %v368_v19 = vld [vmem:[#allocation7 + $0x20] sm:$0xff]  ;;  %v369_v20 = vld [vmem:[#allocation7 + $0x28] sm:$0xff]  ;;  %p900_p11 = scmp.ne.s32.totalorder %s1226_s7, %s899_s9  ;;  %p1287_p0 = scmp.ne.s32.totalorder %s1282_s23, 0 }
  0x6e   : > { %v699_v21 = vpack.c.bf16 %v276_v17, %v275_v16  ;;  %v277_v22 = vld [vmem:[#allocation5 + $0x40] sm:$0xff]  ;;  %v278_v23 = vld [vmem:[#allocation5 + $0x48] sm:$0xff]  ;;  %v720_v24 = vpack.c.bf16 %v369_v20, %v368_v19  ;;  %v370_v25 = vld [vmem:[#allocation7 + $0x30] sm:$0xff]  ;;  %s979_s22 = smov [#allocation8]  }
  0x6f   : > { %715 = vmatpush3.bf16.msra.mxu1 %v714_v15  ;;  %v371_v26 = vld [vmem:[#allocation7 + $0x38] sm:$0xff]  ;;  %v702_v27 = vpack.c.bf16 %v278_v23, %v277_v22  ;;  %v279_v28 = vld [vmem:[#allocation5 + $0x50] sm:$0xff]  ;;  %v372_v31 = vld [vmem:[#allocation7 + $0x40] sm:$0xff]  ;;  %p901_p1 = pnand %p900_p11, %p1287_p0  ;;  %s903_s13 = sshll.u32 %s979_s22, 4  ;;  %s904_s13 = int_to_ptr.vmem [resolvable:$false] %s903_s13 }
  0x70   : > { %694 = vmatpush3.bf16.msra.mxu0 %v693_v7  ;;  %716 = vmatprep.subr.bf16.mxu1 %v976_v0  ;;  %v280_v29 = vld [vmem:[#allocation5 + $0x58] sm:$0xff]  ;;  %v723_v30 = vpack.c.bf16 %v371_v26, %v370_v25  ;;  %v373_v32 = vld [vmem:[#allocation7 + $0x48] sm:$0xff]  ;;  %v281_v34 = vld [vmem:[#allocation5 + $0x60] sm:$0xff]  ;;  %s905_s29 = scalar_lea.vmem %s904_s13, 256  ;;  %p906_p7 = scmp.lt.s32.totalorder %s1226_s7, %s904_s13 }
  0x71   : > { %695 = vmatprep.subr.bf16.mxu0 %v976_v0  ;;  %v705_v33 = vpack.c.bf16 %v280_v29, %v279_v28  ;;  %v282_v35 = vld [vmem:[#allocation5 + $0x68] sm:$0xff]  ;;  %v726_v36 = vpack.c.bf16 %v373_v32, %v372_v31  ;;  %v374_v37 = vld [vmem:[#allocation7 + $0x50] sm:$0xff]  ;;  %v375_v38 = vld [vmem:[#allocation7 + $0x58] sm:$0xff]  ;;  %p902_p3 = pneg %p901_p1  ;;  %p907_p9 = scmp.lt.s32.totalorder %s905_s29, %s899_s9 }
  0x72   : > { %v708_v39 = vpack.c.bf16 %v282_v35, %v281_v34  ;;  %v283_v40 = vld [vmem:[#allocation5 + $0x70] sm:$0xff]  ;;  %v284_v41 = vld [vmem:[#allocation5 + $0x78] sm:$0xff]  ;;  %v729_v42 = vpack.c.bf16 %v375_v38, %v374_v37  ;;  %v376_v43 = vld [vmem:[#allocation7 + $0x60] sm:$0xff] }
  0x73   : > { %718 = vmatpush3.bf16.msra.mxu1 %v717_v18  ;;  %v377_v44 = vld [vmem:[#allocation7 + $0x68] sm:$0xff]  ;;  %v711_v45 = vpack.c.bf16 %v284_v41, %v283_v40  ;;  %v285_v47 = vld [vmem:[%s1185_s17] sm:$0xff]  ;;  %p908_p12 = por %p907_p9, %p906_p7 }
  0x74   : > { %697 = vmatpush3.bf16.msra.mxu0 %v696_v14  ;;  %719 = vmatprep.subr.bf16.mxu1 %v976_v0  ;;  %v732_v46 = vpack.c.bf16 %v377_v44, %v376_v43  ;;  %v378_v48 = vld [vmem:[#allocation7 + $0x70] sm:$0xff]  ;;  %v379_v49 = vld [vmem:[#allocation7 + $0x78] sm:$0xff] }
  0x75   : > { %698 = vmatprep.subr.bf16.mxu0 %v976_v0  ;;  %v735_v50 = vpack.c.bf16 %v379_v49, %v378_v48  ;;  %v579_v51 = vld [vmem:[%s1270_s2] ss:$0 sm:$0xff]  ;;  %p909_p2 = pnand %p908_p12, %p902_p3 }
  0x76   : > { %v580_v56 = vld [vmem:[%s1272_s4] ss:$0 sm:$0xff] }
  0x77   : > { %721 = vmatpush3.bf16.msra.mxu1 %v720_v24 }
  0x78   : > { %700 = vmatpush3.bf16.msra.mxu0 %v699_v21  ;;  %722 = vmatprep.subr.bf16.mxu1 %v976_v0 }
  0x79   : > { %701 = vmatprep.subr.bf16.mxu0 %v976_v0 }
  0x7b   : > { %724 = vmatpush3.bf16.msra.mxu1 %v723_v30 }
  0x7c   : > { %703 = vmatpush3.bf16.msra.mxu0 %v702_v27  ;;  %725 = vmatprep.subr.bf16.mxu1 %v976_v0 }
  0x7d   : > { %704 = vmatprep.subr.bf16.mxu0 %v976_v0 }
  0x7f   : > { %727 = vmatpush3.bf16.msra.mxu1 %v726_v36 }
  0x80   : > { %706 = vmatpush3.bf16.msra.mxu0 %v705_v33  ;;  %728 = vmatprep.subr.bf16.mxu1 %v976_v0 }
  0x81   : > { %707 = vmatprep.subr.bf16.mxu0 %v976_v0 }
  0x83   : > { %730 = vmatpush3.bf16.msra.mxu1 %v729_v42 }
  0x84   : > { %709 = vmatpush3.bf16.msra.mxu0 %v708_v39  ;;  %731 = vmatprep.subr.bf16.mxu1 %v976_v0 }
  0x85   : > { %710 = vmatprep.subr.bf16.mxu0 %v976_v0 }
  0x87   : > { %733 = vmatpush3.bf16.msra.mxu1 %v732_v46 }
  0x88   : > { %712 = vmatpush3.bf16.msra.mxu0 %v711_v45  ;;  %734 = vmatprep.subr.bf16.mxu1 %v976_v0 }
  0x8b   : > { %652 = vmatmul.mubr.f32.vlgmr.msra.gmra.mrb[0].mxu0 %v285_v47  ;;  %736 = vmatpush3.bf16.msra.mxu1 %v735_v50 }
 0x15e   : > { %v359_v52 = vpop.f32.mrb[0].mxu0 }
 0x15f   : > { %v360_v53 = vadd.f32 %v579_v51, %v359_v52  ;;  %v653_v54 = vpop.f32.mrb[1].mxu0 }
 0x161   : > { %v363_v55 = vmax.f32 %v360_v53, 0.0 }
 0x163   : > { %687 = vmatmul.mubr.f32.vlgmr.msra.gmra.mrb[0].mxu1 %v363_v55 }
 0x236   : > { %v453_v57 = vpop.f32.mrb[0].mxu1 }
 0x237   : > { %v454_v58 = vadd.f32 %v580_v56, %v453_v57  ;;  %v688_v59 = vpop.f32.mrb[1].mxu1 }
 0x239   : > { %v457_v60 = vsub.f32 0.0, %v454_v58 }
 0x23b   : > { %v458_v61 = vmul.f32 1.442695, %v457_v60 }
 0x23d   : > { %809 = vpow2.f32 %v458_v61 }
 0x247   : > { %v810_v62 = vpop.eup %809 }
 0x248   : > { %v460_v63 = vadd.f32 1.0, %v810_v62 }
 0x24a   : > { %811 = vrcp.f32 %v460_v63 }
 0x254   : > { %v812_v0 = vpop.eup %811 }
 0x255   : > { %v462_v1 = vmul.f32 2.0, %v812_v0 }
 0x257   : > { %463 = vst [vmem:[%s268_s28] sm:$0xff] %v462_v1 }
 0x258   : > { %912 = shalt.err (!%p909_p2)
}
 0x259   : > { %s913_s12 = scalar_lea.hbm %s1224_s15, 128  ;;  %s917_s26 = scalar_lea.hbm %s1273_s5, 256 }
 0x25a   : > { %p914_p13 = scmp.ne.s32.totalorder %s1224_s15, %s913_s12  ;;  %p918_p4 = scmp.lt.u32.totalorder %s1224_s15, %s1273_s5 }
 0x25b   : > { %p919_p5 = scmp.lt.u32.totalorder %s917_s26, %s913_s12  ;;  %p921_p11 = scmp.lt.u32.totalorder %s913_s12, %s1224_s15 }
 0x25c   : > { %p915_p6 = pnand %p914_p13, %p1287_p0 }
 0x25d   : > { %p920_p8 = por %p919_p5, %p918_p4 }
 0x25e   : > { %p916_p10 = pneg %p915_p6 }
 0x25f   : > { %p922_p1 = por %p921_p11, %p920_p8 }
 0x261   : > { %p923_p3 = pnand %p922_p1, %p916_p10 }
 0x263   : > { %926 = shalt.err (!%p923_p3)
}
 0x264   : > { %747 = dma.vmem_to_hbm [thread:$0]  (%p1287_p0), %s1226_s7, 128, %s1224_s15, %s465_s16  }
 0x265 PF: > { %s490_s11 = sand.u32 1, %s957_s18   ;;  %p1288_p7 = scmp.ne.s32.totalorder %s1278_s25, 0 }
 0x266   : > { %p1289_p9 = scmp.ge.s32.totalorder %s969_s21, 2  ;;  %s491_s28 = scalar_lea.sflag [#allocation4], %s490_s11 }
 0x268   : > { %p761_p12 = pnand %p1289_p9, %p1288_p7 }
 0x26a   : > { %952 = dma.done.wait (!%p761_p12), %s491_s28, 128  }
 0x26b   : > { %954 = vsyncadd (!%p761_p12), %s491_s28, 4294967168  ;;  %p19_p2 = scmp.ge.s32.totalorder %s1120_s14, 4   ;;  %s1290_s18 = smov %s961_s19 }
 0x26c   : > { %s1291_s19 = smov %s965_s20  ;;  %s1292_s20 = smov %s1136_s27 }
 0x26d   : > { %s1293_s21 = smov %s1120_s14  ;;  %21 = sbr.rel (!%p19_p2) target bundleno = 6 (0x6), region = 93 }
 0x274   :  { %496 = vsyncpa [#allocation3], 1 }
 0x275   :  { %498 = vsyncpa [#allocation3 + $0x1], 1 }
 0x276   :  { %499 = vsyncpa [#allocation6], 1 }
 0x277   :  { %500 = vsyncpa [#allocation4], 1 }
 0x278   :  { %502 = vsyncpa [#allocation4 + $0x1], 1 }

</bundles_post_ra>
